<compile_context>
chip_gen: v6e
topology: v6e:2x2x1
jax: 0.10.0
libtpu: 0.0.40
codegen_flags: <defaults>
</compile_context>

<pallas_src>
from functools import partial

import jax
import jax.numpy as jnp
from jax.experimental import pallas as pl
from jax.experimental.pallas import tpu as pltpu

LANE = 128
A_TILE_BUDGET_BYTES = 12 * 1024 * 1024   # budget for the double-buffered bf16 A tile
VMEM_LIMIT_BYTES = 40 * 1024 * 1024      # explicit scoped-VMEM limit (safe on v7x 64 MiB)


def _pad_to(x, m):
    return ((x + m - 1) // m) * m


def _choose_tm(n_p):
    for tm in (512, 256, 128):
        if n_p % tm == 0:
            return tm
    return n_p


def _choose_tk(n_p, num_rels, tm, max_k_elems=None):
    """Width of the contraction (R*N) tile for the aggregation matmul."""
    full = num_rels * n_p
    fused_ok = tm * full * 2 * 2 <= A_TILE_BUDGET_BYTES   # bf16, double buffered
    if fused_ok and (max_k_elems is None or full <= max_k_elems):
        return full                       # single long contraction, no reduction steps
    tk = n_p                              # fall back: one relation per grid step
    while tm * tk * 2 * 2 > A_TILE_BUDGET_BYTES and tk % (2 * LANE) == 0:
        tk //= 2
    if max_k_elems is not None:
        while tk > max_k_elems and tk % (2 * LANE) == 0:
            tk //= 2
    return tk


# --------------------------------------------------------------------------- kernels

def msg_kernel(comb_ref, h_ref, wall_ref, bias_ref, msg_ref, self_ref, *,
               num_rels, num_bases, dout_p):
    # One wide bf16 MXU matmul over the stacked [V_0 | ... | V_{B-1} | W_self] slab.
    h_bf = h_ref[...].astype(jnp.bfloat16)
    prod = jnp.dot(h_bf, wall_ref[...], preferred_element_type=jnp.float32)

    # Self-loop slab + bias (f32); consumed as the accumulator init of the agg kernel.
    self_ref[...] = prod[:, num_bases * dout_p:] + bias_ref[...]

    # Per-relation messages: cheap VPU combine of the basis products (comb in SMEM).
    for r in range(num_rels):
        m = comb_ref[r, 0] * prod[:, 0:dout_p]
        for b in range(1, num_bases):
            m = m + comb_ref[r, b] * prod[:, b * dout_p:(b + 1) * dout_p]
        msg_ref[r] = m.astype(jnp.bfloat16)


def agg_kernel(a_ref, msg_ref, self_ref, out_ref, *, activation):
    k = pl.program_id(1)

    @pl.when(k == 0)
    def _():
        out_ref[...] = self_ref[...]          # self-loop + bias init (no extra scratch)

    out_ref[...] += jnp.dot(a_ref[...], msg_ref[...],
                            preferred_element_type=jnp.float32)

    @pl.when(k == pl.num_programs(1) - 1)
    def _():
        x = out_ref[...]
        if activation == "leaky_relu":
            out_ref[...] = jnp.where(x > 0, x, jnp.float32(0.01) * x)
        else:
            out_ref[...] = jnp.tanh(x)


# --------------------------------------------------------------------------- wrappers

def _msg_call(comb, h, w_all, bias_row, *, num_rels, num_bases, dout_p, tm):
    n_p, din_p = h.shape
    kernel = partial(msg_kernel, num_rels=num_rels, num_bases=num_bases, dout_p=dout_p)
    return pl.pallas_call(
        kernel,
        out_shape=(jax.ShapeDtypeStruct((num_rels, n_p, dout_p), jnp.bfloat16),
                   jax.ShapeDtypeStruct((n_p, dout_p), jnp.float32)),
        grid_spec=pltpu.PrefetchScalarGridSpec(
            num_scalar_prefetch=0,
            grid=(n_p // tm,),
            in_specs=[
                pl.BlockSpec(memory_space=pltpu.MemorySpace.SMEM),              # comb (R,B)
                pl.BlockSpec((tm, din_p), lambda i: (i, 0)),                     # H row tile
                pl.BlockSpec((din_p, (num_bases + 1) * dout_p), lambda i: (0, 0)),  # W slab
                pl.BlockSpec((1, dout_p), lambda i: (0, 0)),                     # bias
            ],
            out_specs=(
                pl.BlockSpec((num_rels, tm, dout_p), lambda i: (0, i, 0)),       # messages
                pl.BlockSpec((tm, dout_p), lambda i: (i, 0)),                    # self + bias
            ),
        ),
        compiler_params=pltpu.CompilerParams(
            dimension_semantics=("parallel",),
            vmem_limit_bytes=VMEM_LIMIT_BYTES),
    )(comb, h, w_all, bias_row)


def _agg_call(a_flat, msg_flat, selfpart, *, activation, tm, tk):
    n_p, ctr = a_flat.shape
    dout_p = msg_flat.shape[1]
    kernel = partial(agg_kernel, activation=activation)
    return pl.pallas_call(
        kernel,
        out_shape=jax.ShapeDtypeStruct((n_p, dout_p), jnp.float32),
        grid_spec=pltpu.PrefetchScalarGridSpec(
            num_scalar_prefetch=0,
            grid=(n_p // tm, ctr // tk),
            in_specs=[
                pl.BlockSpec((tm, tk), lambda i, k: (i, k)),        # A row tile (bf16)
                pl.BlockSpec((tk, dout_p), lambda i, k: (k, 0)),    # messages (bf16)
                pl.BlockSpec((tm, dout_p), lambda i, k: (i, 0)),    # self-loop + bias
            ],
            out_specs=pl.BlockSpec((tm, dout_p), lambda i, k: (i, 0)),
        ),
        compiler_params=pltpu.CompilerParams(
            dimension_semantics=("parallel", "arbitrary"),
            vmem_limit_bytes=VMEM_LIMIT_BYTES),
    )(a_flat, msg_flat, selfpart)


# --------------------------------------------------------------------------- model glue

def make_layer_params(key, din, dout, num_rels, num_bases):
    """Basis-regularized RelGraphConv params, deterministic Glorot-ish init."""
    k1, k2, k3, k4 = jax.random.split(key, 4)
    scale = (6.0 / (din + dout)) ** 0.5
    bases = jax.random.uniform(k1, (num_bases, din, dout), jnp.float32, -scale, scale)
    comb = jax.random.uniform(k2, (num_rels, num_bases), jnp.float32, -1.0, 1.0)
    w_self = jax.random.uniform(k3, (din, dout), jnp.float32, -scale, scale)
    bias = jax.random.uniform(k4, (1, dout), jnp.float32, -0.1, 0.1)
    return dict(bases=bases, comb=comb, w_self=w_self, bias=bias)


def rel_graph_conv(h, a_flat, p, activation, *, max_k_elems=None):
    """One RelGraphConv layer = message kernel + aggregation kernel."""
    n_p, din_p = h.shape
    num_bases, din, dout = p["bases"].shape
    num_rels = p["comb"].shape[0]
    dout_p = _pad_to(dout, LANE)

    # Lane-pad weights; stack bases and the self-loop weight into one (Din_p, (B+1)*Dout_p) slab.
    bases_p = jnp.pad(p["bases"], ((0, 0), (0, din_p - din), (0, dout_p - dout)))
    wself_p = jnp.pad(p["w_self"], ((0, din_p - din), (0, dout_p - dout)))
    w_all = jnp.concatenate(
        [bases_p.transpose(1, 0, 2).reshape(din_p, num_bases * dout_p), wself_p],
        axis=1).astype(jnp.bfloat16)
    bias_p = jnp.pad(p["bias"], ((0, 0), (0, dout_p - dout)))       # (1, Dout_p) f32

    tm = _choose_tm(n_p)
    msg, selfpart = _msg_call(p["comb"].astype(jnp.float32), h, w_all, bias_p,
                              num_rels=num_rels, num_bases=num_bases,
                              dout_p=dout_p, tm=tm)
    msg_flat = msg.reshape(num_rels * n_p, dout_p)                  # row-contiguous reshape
    tk = _choose_tk(n_p, num_rels, tm, max_k_elems)
    return _agg_call(a_flat, msg_flat, selfpart, activation=activation, tm=tm, tk=tk)


def rgcn_forward(features, adj, params, node_offsets, *, max_k_elems=None):
    """Full RGCN forward: stacked RelGraphConv layers + per-graph first-node gather."""
    num_rels, n, _ = adj.shape
    n_p = _pad_to(n, LANE)
    din = features.shape[1]
    din_p = _pad_to(din, LANE)

    # Graph is fixed across layers: pad + flatten + bf16-cast the adjacency ONCE.
    adj_p = jnp.pad(adj, ((0, 0), (0, n_p - n), (0, n_p - n)))
    a_flat = adj_p.transpose(1, 0, 2).reshape(n_p, num_rels * n_p).astype(jnp.bfloat16)

    h = jnp.pad(features, ((0, n_p - n), (0, din_p - din)))         # f32, lane-padded
    n_layers = len(params)
    for li, p in enumerate(params):
        act = "tanh" if li == n_layers - 1 else "leaky_relu"
        h = rel_graph_conv(h, a_flat, p, act, max_k_elems=max_k_elems)

    # Emulate dgl.unbatch + "take first node of each graph"; slice the lane-dense slab.
    out_dim = params[-1]["bases"].shape[-1]
    return h[node_offsets, :out_dim]


def rgcn_reference(features, adj, params, node_offsets):
    """Pure-JAX reference mirroring the kernel's bf16 casts (f32 accumulation)."""
    bf = lambda x: x.astype(jnp.bfloat16).astype(jnp.float32)
    adj_b = bf(adj)
    h = features
    n_layers = len(params)
    for li, p in enumerate(params):
        hb = bf(h)
        basis_msgs = jnp.einsum("nd,bdo->bno", hb, bf(p["bases"]))       # H @ V_b
        msg = bf(jnp.einsum("rb,bno->rno", p["comb"], basis_msgs))       # comb combine
        agg = jnp.einsum("rvn,rno->vo", adj_b, msg)                      # sum_r A_r @ msg_r
        out = agg + hb @ bf(p["w_self"]) + p["bias"]
        h = jnp.tanh(out) if li == n_layers - 1 else jnp.where(out > 0, out, 0.01 * out)
    return h[node_offsets, :]


if __name__ == "__main__":
    key = jax.random.PRNGKey(0)

    # Small synthetic batched graph: 2 graphs x 136 nodes (N=272 -> padded 384, 3 row tiles).
    num_graphs = 2
    nodes_per_graph = 136
    n_nodes = num_graphs * nodes_per_graph
    num_rels = 3
    num_bases = 2
    in_dim = 8
    hidden_dimensions = [16, 16, 3]      # output dim 3, matching torch output (num_graphs, 3)
    edges_per_graph = 300

    k_feat, k_edges, k_types, k_params = jax.random.split(key, 4)

    features = jax.random.normal(k_feat, (n_nodes, in_dim), jnp.float32)

    # Random intra-graph edges + relation types; norm = 1/in_degree (DGL 'norm' edata).
    ek = jax.random.split(k_edges, num_graphs)
    src_list, dst_list = [], []
    for gi in range(num_graphs):
        e = jax.random.randint(ek[gi], (2, edges_per_graph), 0, nodes_per_graph)
        src_list.append(e[0] + gi * nodes_per_graph)
        dst_list.append(e[1] + gi * nodes_per_graph)
    src = jnp.concatenate(src_list)
    dst = jnp.concatenate(dst_list)
    etypes = jax.random.randint(k_types, (src.shape[0],), 0, num_rels)

    in_deg = jnp.zeros((n_nodes,), jnp.float32).at[dst].add(1.0)
    norm = 1.0 / jnp.maximum(in_deg, 1.0)
    edge_norm = norm[dst]

    adj = jnp.zeros((num_rels, n_nodes, n_nodes), jnp.float32)
    adj = adj.at[etypes, dst, src].add(edge_norm)  # A[r, v, u]

    dims = [in_dim] + hidden_dimensions
    pkeys = jax.random.split(k_params, len(dims) - 1)
    params = [make_layer_params(pkeys[i], dims[i], dims[i + 1], num_rels, num_bases)
              for i in range(len(dims) - 1)]

    node_offsets = jnp.arange(num_graphs) * nodes_per_graph  # first node of each graph

    ref = rgcn_reference(features, adj, params, node_offsets)

    # Fused single-contraction path (TK = R * N_padded, no reduction steps).
    out = jax.block_until_ready(rgcn_forward(features, adj, params, node_offsets))
    # Relation-tiled reduction path (TK = N_padded, k-grid accumulation into out_ref).
    out_tiled = jax.block_until_ready(
        rgcn_forward(features, adj, params, node_offsets,
                     max_k_elems=_pad_to(n_nodes, LANE)))

    assert out.shape == (num_graphs, hidden_dimensions[-1])
    assert jnp.allclose(out, ref, atol=1e-2, rtol=1e-2), (out, ref)
    assert jnp.allclose(out_tiled, ref, atol=1e-2, rtol=1e-2), (out_tiled, ref)

    # TODO(synk): feat_drop dropout is identity here (rate 0 / eval mode); stochastic
    # dropout would use pltpu.prng_seed + pltpu.stateful_bernoulli if needed.
    print("KERNEL_OK")
</pallas_src>

<mosaic_0001>
module attributes {stable_mosaic.version = 11 : i64} {
  func.func @msg_kernel(%arg0: i32, %arg1: memref<3x2xf32, #tpu.memory_space<smem>>, %arg2: memref<128x128xf32, #tpu.memory_space<vmem>>, %arg3: memref<128x384xbf16, #tpu.memory_space<vmem>>, %arg4: memref<1x128xf32, #tpu.memory_space<vmem>>, %arg5: memref<3x128x128xbf16, #tpu.memory_space<vmem>>, %arg6: memref<128x128xf32, #tpu.memory_space<vmem>>) attributes {dimension_semantics = [#tpu.dimension_semantics<parallel>], iteration_bounds = array<i64: 3>, scalar_prefetch = 0 : i64, scratch_operands = 0 : i64, tpu.core_type = #tpu.core_type<tc>, window_params = [{transform_indices = @transform_0, window_bounds = array<i64: 3, 2>}, {transform_indices = @transform_1, window_bounds = array<i64: 128, 128>}, {pipeline_mode = #tpu.pipeline_mode<synchronous>, transform_indices = @transform_2, window_bounds = array<i64: 128, 384>}, {pipeline_mode = #tpu.pipeline_mode<synchronous>, transform_indices = @transform_3, window_bounds = array<i64: 1, 128>}, {transform_indices = @transform_4, window_bounds = array<i64: 3, 128, 128>}, {transform_indices = @transform_5, window_bounds = array<i64: 128, 128>}]} {
    %c0 = arith.constant 0 : index
    %c0_0 = arith.constant 0 : index
    %0 = vector.load %arg2[%c0, %c0_0] : memref<128x128xf32, #tpu.memory_space<vmem>>, vector<128x128xf32>
    %1 = arith.truncf %0 : vector<128x128xf32> to vector<128x128xbf16>
    %c0_1 = arith.constant 0 : index
    %c0_2 = arith.constant 0 : index
    %2 = vector.load %arg3[%c0_1, %c0_2] : memref<128x384xbf16, #tpu.memory_space<vmem>>, vector<128x384xbf16>
    %cst = arith.constant dense<0.000000e+00> : vector<128x384xf32>
    %3 = tpu.matmul %1, %2, %cst {dimension_numbers = #tpu.dot_dimension_numbers<[1], [0], [0], [1], [0, 0, 1, 1], [], []>} : vector<128x128xbf16>, vector<128x384xbf16>, vector<128x384xf32> -> vector<128x384xf32>
    %4 = vector.extract_strided_slice %3 {offsets = [0, 256], sizes = [128, 128], strides = [1, 1]} : vector<128x384xf32> to vector<128x128xf32>
    %c0_3 = arith.constant 0 : index
    %c0_4 = arith.constant 0 : index
    %5 = vector.load %arg4[%c0_3, %c0_4] : memref<1x128xf32, #tpu.memory_space<vmem>>, vector<1x128xf32>
    %6 = vector.broadcast %5 : vector<1x128xf32> to vector<128x128xf32>
    %7 = arith.addf %4, %6 : vector<128x128xf32>
    %c0_5 = arith.constant 0 : index
    %c0_6 = arith.constant 0 : index
    %8 = vector.load %arg6[%c0_5, %c0_6] : memref<128x128xf32, #tpu.memory_space<vmem>>, vector<128x128xf32>
    tpu.vector_store %arg6[%c0_5, %c0_6], %7 {strides = array<i32>} : memref<128x128xf32, #tpu.memory_space<vmem>>, vector<128x128xf32>,
    %c0_7 = arith.constant 0 : index
    %c0_8 = arith.constant 0 : index
    %9 = memref.load %arg1[%c0_7, %c0_8] : memref<3x2xf32, #tpu.memory_space<smem>>
    %10 = vector.extract_strided_slice %3 {offsets = [0, 0], sizes = [128, 128], strides = [1, 1]} : vector<128x384xf32> to vector<128x128xf32>
    %11 = vector.broadcast %9 : f32 to vector<128x128xf32>
    %12 = arith.mulf %11, %10 : vector<128x128xf32>
    %c0_9 = arith.constant 0 : index
    %c1 = arith.constant 1 : index
    %13 = memref.load %arg1[%c0_9, %c1] : memref<3x2xf32, #tpu.memory_space<smem>>
    %14 = vector.extract_strided_slice %3 {offsets = [0, 128], sizes = [128, 128], strides = [1, 1]} : vector<128x384xf32> to vector<128x128xf32>
    %15 = vector.broadcast %13 : f32 to vector<128x128xf32>
    %16 = arith.mulf %15, %14 : vector<128x128xf32>
    %17 = arith.addf %12, %16 : vector<128x128xf32>
    %18 = arith.truncf %17 : vector<128x128xf32> to vector<128x128xbf16>
    %c0_10 = arith.constant 0 : index
    %c0_11 = arith.constant 0 : index
    %c0_12 = arith.constant 0 : index
    %19 = vector.load %arg5[%c0_10, %c0_11, %c0_12] : memref<3x128x128xbf16, #tpu.memory_space<vmem>>, vector<1x128x128xbf16>
    %20 = vector.shape_cast %19 : vector<1x128x128xbf16> to vector<128x128xbf16>
    %21 = vector.shape_cast %18 : vector<128x128xbf16> to vector<1x128x128xbf16>
    tpu.vector_store %arg5[%c0_10, %c0_11, %c0_12], %21 {strides = array<i32>} : memref<3x128x128xbf16, #tpu.memory_space<vmem>>, vector<1x128x128xbf16>,
    %c1_13 = arith.constant 1 : index
    %c0_14 = arith.constant 0 : index
    %22 = memref.load %arg1[%c1_13, %c0_14] : memref<3x2xf32, #tpu.memory_space<smem>>
    %23 = vector.extract_strided_slice %3 {offsets = [0, 0], sizes = [128, 128], strides = [1, 1]} : vector<128x384xf32> to vector<128x128xf32>
    %24 = vector.broadcast %22 : f32 to vector<128x128xf32>
    %25 = arith.mulf %24, %23 : vector<128x128xf32>
    %c1_15 = arith.constant 1 : index
    %c1_16 = arith.constant 1 : index
    %26 = memref.load %arg1[%c1_15, %c1_16] : memref<3x2xf32, #tpu.memory_space<smem>>
    %27 = vector.extract_strided_slice %3 {offsets = [0, 128], sizes = [128, 128], strides = [1, 1]} : vector<128x384xf32> to vector<128x128xf32>
    %28 = vector.broadcast %26 : f32 to vector<128x128xf32>
    %29 = arith.mulf %28, %27 : vector<128x128xf32>
    %30 = arith.addf %25, %29 : vector<128x128xf32>
    %31 = arith.truncf %30 : vector<128x128xf32> to vector<128x128xbf16>
    %c1_17 = arith.constant 1 : index
    %c0_18 = arith.constant 0 : index
    %c0_19 = arith.constant 0 : index
    %32 = vector.load %arg5[%c1_17, %c0_18, %c0_19] : memref<3x128x128xbf16, #tpu.memory_space<vmem>>, vector<1x128x128xbf16>
    %33 = vector.shape_cast %32 : vector<1x128x128xbf16> to vector<128x128xbf16>
    %34 = vector.shape_cast %31 : vector<128x128xbf16> to vector<1x128x128xbf16>
    tpu.vector_store %arg5[%c1_17, %c0_18, %c0_19], %34 {strides = array<i32>} : memref<3x128x128xbf16, #tpu.memory_space<vmem>>, vector<1x128x128xbf16>,
    %c2 = arith.constant 2 : index
    %c0_20 = arith.constant 0 : index
    %35 = memref.load %arg1[%c2, %c0_20] : memref<3x2xf32, #tpu.memory_space<smem>>
    %36 = vector.extract_strided_slice %3 {offsets = [0, 0], sizes = [128, 128], strides = [1, 1]} : vector<128x384xf32> to vector<128x128xf32>
    %37 = vector.broadcast %35 : f32 to vector<128x128xf32>
    %38 = arith.mulf %37, %36 : vector<128x128xf32>
    %c2_21 = arith.constant 2 : index
    %c1_22 = arith.constant 1 : index
    %39 = memref.load %arg1[%c2_21, %c1_22] : memref<3x2xf32, #tpu.memory_space<smem>>
    %40 = vector.extract_strided_slice %3 {offsets = [0, 128], sizes = [128, 128], strides = [1, 1]} : vector<128x384xf32> to vector<128x128xf32>
    %41 = vector.broadcast %39 : f32 to vector<128x128xf32>
    %42 = arith.mulf %41, %40 : vector<128x128xf32>
    %43 = arith.addf %38, %42 : vector<128x128xf32>
    %44 = arith.truncf %43 : vector<128x128xf32> to vector<128x128xbf16>
    %c2_23 = arith.constant 2 : index
    %c0_24 = arith.constant 0 : index
    %c0_25 = arith.constant 0 : index
    %45 = vector.load %arg5[%c2_23, %c0_24, %c0_25] : memref<3x128x128xbf16, #tpu.memory_space<vmem>>, vector<1x128x128xbf16>
    %46 = vector.shape_cast %45 : vector<1x128x128xbf16> to vector<128x128xbf16>
    %47 = vector.shape_cast %44 : vector<128x128xbf16> to vector<1x128x128xbf16>
    tpu.vector_store %arg5[%c2_23, %c0_24, %c0_25], %47 {strides = array<i32>} : memref<3x128x128xbf16, #tpu.memory_space<vmem>>, vector<1x128x128xbf16>,
    return
  }
  func.func @transform_0(%arg0: i32) -> (i32, i32) {
    %c0_i32 = arith.constant 0 : i32
    %c0_i32_0 = arith.constant 0 : i32
    %c0_i32_1 = arith.constant 0 : i32
    return %c0_i32, %c0_i32_0 : i32, i32
  }
  func.func @transform_1(%arg0: i32) -> (i32, i32) {
    %c0_i32 = arith.constant 0 : i32
    %c0_i32_0 = arith.constant 0 : i32
    return %arg0, %c0_i32 : i32, i32
  }
  func.func @transform_2(%arg0: i32) -> (i32, i32) {
    %c0_i32 = arith.constant 0 : i32
    %c0_i32_0 = arith.constant 0 : i32
    %c0_i32_1 = arith.constant 0 : i32
    return %c0_i32, %c0_i32_0 : i32, i32
  }
  func.func @transform_3(%arg0: i32) -> (i32, i32) {
    %c0_i32 = arith.constant 0 : i32
    %c0_i32_0 = arith.constant 0 : i32
    %c0_i32_1 = arith.constant 0 : i32
    return %c0_i32, %c0_i32_0 : i32, i32
  }
  func.func @transform_4(%arg0: i32) -> (i32, i32, i32) {
    %c0_i32 = arith.constant 0 : i32
    %c0_i32_0 = arith.constant 0 : i32
    %c0_i32_1 = arith.constant 0 : i32
    return %c0_i32, %arg0, %c0_i32_0 : i32, i32, i32
  }
  func.func @transform_5(%arg0: i32) -> (i32, i32) {
    %c0_i32 = arith.constant 0 : i32
    %c0_i32_0 = arith.constant 0 : i32
    return %arg0, %c0_i32 : i32, i32
  }
}

</mosaic_0001>

<bundles_post_ra>
// kernel: tpu_custom_call.1
= control target key start
LH: loop header
LB: loop body
LE: loop exit
PB: predicated region body
PF: predicated region fallthrough
CT: control target
= control target key end

     0   :  { %s2414_s0 = inlined_call_operand.vmem [shape: f32[3,2], index: 0, kind: input, shape index: {}]   ;;  %s2415_s1 = inlined_call_operand.hbm [shape: f32[384,128], index: 1, kind: input, shape index: {}]   ;;  %s2416_s2 = inlined_call_operand.hbm [shape: bf16[128,384], index: 2, kind: input, shape index: {}]   ;;  %s2417_s3 = inlined_call_operand.vmem [shape: f32[1,128], index: 3, kind: input, shape index: {}]   ;;  %s2418_s4 = inlined_call_operand.hbm [shape: bf16[3,384,128], index: 4, kind: output, shape index: {0}]   ;;  %s2419_s5 = inlined_call_operand.hbm [shape: f32[384,128], index: 5, kind: output, shape index: {1}]  }
   0x1   :  { %2425 = sst [smem:[#allocation20_spill]] %s2414_s0 }
   0x2   :  { %11 = vsyncpa [#allocation5], 0 }
   0x3   :  { %12 = vsyncpa [#allocation3], 0 }
   0x4   :  { %14 = vsyncpa [#allocation3 + $0x1], 0 }
   0x5   :  { %15 = vsyncpa [#allocation8], 0 }
   0x6   :  { %16 = vsyncpa [#allocation4], 0 }
   0x7   :  { %18 = vsyncpa [#allocation4 + $0x1], 0 }
   0x8   :  { %19 = vsyncpa [#allocation11], 0 }
   0x9   :  { %21 = vsyncpa [#allocation11 + $0x1], 0  ;;  %s1995_s18 = smov 0   ;;  %s1997_s19 = smov 0  }
   0xa   :  { %s1999_s20 = smov 0   ;;  %s2001_s21 = smov 0  }
   0xb LB: > { %s2016_s22 = sadd.s32 4294967295, %s1945_s21   ;;  %s1303_s23 = sadd.s32 4294967294, %s1945_s21   ;;  %s1945_s21 = sphi %s2001_s21, %s2448_s21   ;;  %s1941_s20 = sphi %s1999_s20, %s2447_s20   ;;  %s1937_s19 = sphi %s1997_s19, %s2446_s19   ;;  %s1933_s18 = sphi %s1995_s18, %s2445_s18  }
   0xc   : > { %s2020_s24 = sadd.s32 1, %s1945_s21   ;;  %s55_s25 = sadd.s32 1, %s1941_s20 }
   0xd   : > { %s52_s26 = ssub.s32 %s1945_s21, %s2020_s24  ;;  %p62_p0 = scmp.ne.s32.totalorder %s1941_s20, %s1937_s19 }
   0xe   : > { %p53_p1 = scmp.eq.s32.totalorder %s52_s26, 0  ;;  %p63_p2 = scmp.eq.s32.totalorder %s1945_s21, 0 }
   0xf   : > { %p68_p3 = scmp.ne.s32.totalorder %s1937_s19, %s1933_s18  ;;  %p2420_p4 = scmp.eq.s32.totalorder %s2016_s22, 0 }
  0x10   : > { %s2032_s27 = scalar_select %p53_p1, %s1941_s20, %s55_s25  }
  0x11   : > { %p2034_p5 = por %p63_p2, %p62_p0  ;;  %p2040_p6 = por %p2420_p4, %p68_p3 }
  0x12   : > { %2426 = sst [smem:[#allocation19_spill]] %s2032_s27  ;;  %p134_p7 = scmp.eq.s32.totalorder %s2016_s22, 2 }
  0x13   : > { %s2428_s29 = scalar_select %p2040_p6, 1, 0 }
  0x14   : > { %p140_p8 = scmp.eq.s32.totalorder %s1303_s23, 2  ;;  %p1304_p9 = scmp.ge.s32.totalorder %s1945_s21, 1 }
  0x15   : > { %p173_p10 = scmp.lt.s32.totalorder %s1945_s21, 4  ;;  %p2047_p11 = por %p134_p7, %p62_p0 }
  0x16   : > { %p2051_p12 = por %p140_p8, %p68_p3  ;;  %s2432_s0 = sld [smem:[#allocation20_spill]] }
  0x17   : > { %s2429_s30 = scalar_select %p2047_p11, 1, 0 }
  0x18   : > { %s2430_s6 = scalar_select %p2051_p12, 1, 0 }
  0x19   : > { %p2055_p13 = pnand %p1304_p9, %p173_p10  ;;  %p1716_p0 = scmp.lt.s32.totalorder %s1945_s21, 3 }
  0x1a   : > { %s1947_s13 = smov [#allocation7]  }
  0x1b   : > { %s2431_s7 = scalar_select %p2055_p13, 1, 0 }
  0x1c   : > { %s186_s10 = sshll.u32 %s2432_s0, 4  ;;  %p1696_p1 = pneg %p2055_p13  ;;  %s187_s10 = int_to_ptr.vmem [resolvable:$true] %s186_s10 }
  0x1d   : > { %p2073_p3 = pnand %p1716_p0, %p2034_p5  ;;  %s196_s14 = sshll.u32 %s1947_s13, 4  ;;  %s197_s14 = int_to_ptr.vmem [resolvable:$true] %s196_s14 }
  0x1e   : > { %p2067_p2 = pnand %p1696_p1, %p2420_p4  ;;  %s1800_s15 = scalar_lea.vmem %s187_s10, 64 }
  0x1f   : > { %s2434_s12 = scalar_select %p2073_p3, 1, 0 }
  0x20   : > { %p1801_p7 = scmp.ne.s32.totalorder %s187_s10, %s1800_s15  ;;  %p1802_p8 = pneg %p2067_p2 }
  0x21   : > { %p1808_p1 = scmp.lt.s32.totalorder %s187_s10, %s187_s10  ;;  %p1809_p4 = scmp.lt.s32.totalorder %s1800_s15, %s1800_s15 }
  0x22   : > { %p1803_p9 = pnand %p1802_p8, %p1801_p7 }
  0x23   : > { %p1810_p12 = por %p1809_p4, %p1808_p1 }
  0x24   : > { %p1804_p10 = pneg %p1803_p9 }
  0x26   : > { %p1811_p11 = pnand %p1810_p12, %p1804_p10 }
  0x28   : > { %1814 = shalt.err (!%p1811_p11)
}
  0x29   : > { %s1948_s16 = smov [#allocation2]   ;;  %s213_s17 = sand.u32 1, %s1941_s20  }
  0x2a   : > { %1699 = dma.vmem_to_smem (!%p2067_p2), %s187_s10, 64, %s1948_s16, [#allocation5]  }
  0x2b   : > { %s1826_s23 = scalar_lea.vmem %s197_s14, 3072  ;;  %p1834_p7 = scmp.lt.s32.totalorder %s197_s14, %s197_s14 }
  0x2c   : > { %p1827_p5 = scmp.ne.s32.totalorder %s197_s14, %s1826_s23  ;;  %p1835_p9 = scmp.lt.s32.totalorder %s1826_s23, %s1826_s23 }
  0x2e   : > { %p1829_p0 = pnand %p1827_p5, %p1802_p8  ;;  %p1836_p13 = por %p1835_p9, %p1834_p7 }
  0x30   : > { %p1830_p6 = pneg %p1829_p0 }
  0x32   : > { %p1837_p3 = pnand %p1836_p13, %p1830_p6 }
  0x34   : > { %1840 = shalt.err (!%p1837_p3)
}
  0x35   : > { %s1949_s25 = smov 192   ;;  %s1950_s26 = smov 12  }
  0x36   : > { %1702 = dma.hbm_to_vmem [thread:$0]  (!%p2067_p2), %s2416_s2, 3072, %s197_s14, [#allocation8], %s1949_s25, %s1949_s25, %s1950_s26  }
  0x37   : > { %s1308_s9 = sshll.u32 %s213_s17, 7  ;;  %s1433_s10 = sshll.u32 %s1945_s21, 11 }
  0x38   : > { %s2097_s16 = scalar_lea.hbm %s2415_s1, %s1433_s10  ;;  %s217_s23 = scalar_lea.vmem [#allocation6], %s1308_s9 }
  0x39   : > { %s224_s0 = sshll.u32 %s217_s23, 4  ;;  %s2101_s27 = scalar_lea.sflag [#allocation3], %s213_s17  ;;  %s2099_s0 = int_to_ptr.vmem [resolvable:$true] %s224_s0 }
  0x3a   : > { %s1841_s11 = scalar_lea.hbm %s2097_s16, 2048  ;;  %p2435_p6 = scmp.ne.s32.totalorder %s2434_s12, 0 }
  0x3b   : > { %p1842_p4 = scmp.ne.s32.totalorder %s2097_s16, %s1841_s11  ;;  %s1846_s26 = scalar_lea.hbm %s2415_s1, 6144 }
  0x3c   : > { %p1843_p11 = pneg %p2435_p6  ;;  %p1847_p2 = scmp.lt.s32.totalorder %s2097_s16, %s2415_s1 }
  0x3d   : > { %p1848_p3 = scmp.lt.s32.totalorder %s1846_s26, %s1841_s11 }
  0x3e   : > { %p1844_p12 = pnand %p1843_p11, %p1842_p4 }
  0x3f   : > { %p1849_p8 = por %p1848_p3, %p1847_p2 }
  0x40   : > { %p1845_p13 = pneg %p1844_p12 }
  0x42   : > { %p1850_p10 = pnand %p1849_p8, %p1845_p13 }
  0x44   : > { %1853 = shalt.err (!%p1850_p10)
}
  0x45   : > { %s1854_s17 = scalar_lea.vmem %s2099_s0, 2048  ;;  %s1951_s9 = smov [#allocation6]  }
  0x46   : > { %p1855_p1 = scmp.ne.s32.totalorder %s2099_s0, %s1854_s17  ;;  %s1859_s10 = sshll.u32 %s1951_s9, 4  ;;  %s1860_s10 = int_to_ptr.vmem [resolvable:$false] %s1859_s10 }
  0x47   : > { %s1861_s13 = scalar_lea.vmem %s1860_s10, 4096  ;;  %p1862_p7 = scmp.lt.s32.totalorder %s2099_s0, %s1860_s10 }
  0x48   : > { %p1857_p5 = pnand %p1855_p1, %p1843_p11  ;;  %p1863_p9 = scmp.lt.s32.totalorder %s1861_s13, %s1854_s17 }
  0x4a   : > { %p1858_p0 = pneg %p1857_p5  ;;  %p1864_p4 = por %p1863_p9, %p1862_p7 }
  0x4c   : > { %p1865_p12 = pnand %p1864_p4, %p1858_p0 }
  0x4e   : > { %1868 = shalt.err (!%p1865_p12)
}
  0x4f   : > { %s1952_s15 = smov 128   ;;  %s1953_s23 = smov 8  }
  0x50   : > { %1706 = dma.hbm_to_vmem [thread:$0]  (!%p2435_p6), %s2097_s16, 2048, %s2099_s0, %s2101_s27, %s1952_s15, %s1952_s15, %s1953_s23  }
  0x51   : > { %p2436_p11 = scmp.ne.s32.totalorder %s2431_s7, 0 }
  0x52   : > { %p2437_p13 = scmp.eq.s32.totalorder (!%p2436_p11), %s2016_s22, 0 }
  0x53   : > { %236 = sbr.rel (%p2436_p11) target bundleno = 427 (0x1ab), region = 36 }
  0x58   : > { %1912 = dma.done.wait (%p2437_p13), [#allocation5], 64   ;;  %p2438_p2 = pmov %p2437_p13 }
  0x59   : > { %s2129_s11 = sand.u32 1, %s1937_s19   ;;  %p2439_p6 = scmp.ne.s32.totalorder %s2428_s29, 0 }
  0x5a   : > { %1914 = vsyncadd (%p2438_p2), [#allocation5], 4294967232  ;;  %s1313_s14 = sshll.u32 %s2129_s11, 7  ;;  %s243_s25 = scalar_lea.sflag [#allocation3], %s2129_s11 }
  0x5b   : > { %s2135_s0 = scalar_lea.vmem [#allocation6], %s1313_s14 }
  0x5c   : > { %1916 = dma.done.wait (%p2439_p6), %s243_s25, 2048  }
  0x5d   : > { %1918 = vsyncadd (%p2439_p6), %s243_s25, 4294965248  ;;  %p2440_p3 = pmov %p2438_p2 }
  0x5e   : > { %p2441_p8 = pmov %p2438_p2 }
  0x5f   : > { %1920 = dma.done.wait (%p2440_p3), [#allocation8], 3072  }
  0x60   : > { %1922 = vsyncadd (%p2441_p8), [#allocation8], 4294964224 }
  0x61   : > { %255 = sfence }
  0x62   : > { %v1768_v0 = vld [vmem:[#allocation7 + $0xac] ss:$12 sps:$4 sm:$0xff]   ;;  %v1770_v1 = vld [vmem:[#allocation7 + $0xa8] ss:$12 sps:$4 sm:$0xff]   ;;  %v1954_v2 = vmov 0   ;;  %v287_v11 = vld [vmem:[%s2135_s0] sm:$0xff] }
  0x63   : > { %503 = vmatprep.mubr.bf16.mxu0 %v1954_v2  ;;  %471 = vmatprep.subr.bf16.mxu0 %v1768_v0  ;;  %v1771_v3 = vld [vmem:[#allocation7 + $0x94] ss:$12 sps:$4 sm:$0xff]   ;;  %v1773_v4 = vld [vmem:[#allocation7 + $0x90] ss:$12 sps:$4 sm:$0xff]   ;;  %v1776_v6 = vld [vmem:[#allocation7 + $0x78] ss:$12 sps:$4 sm:$0xff]  }
  0x64   : > { %472 = vmatpush1.bf16.msra.mxu0 %v1770_v1  ;;  %v1774_v5 = vld [vmem:[#allocation7 + $0x7c] ss:$12 sps:$4 sm:$0xff]   ;;  %v1777_v7 = vld [vmem:[#allocation7 + $0x64] ss:$12 sps:$4 sm:$0xff]   ;;  %v1779_v8 = vld [vmem:[#allocation7 + $0x60] ss:$12 sps:$4 sm:$0xff]  }
  0x65   : > { %473 = vmatprep.subr.bf16.mxu0 %v1771_v3  ;;  %v1780_v9 = vld [vmem:[#allocation7 + $0x4c] ss:$12 sps:$4 sm:$0xff]   ;;  %v1792_v10 = vld [vmem:[#allocation7 + $0xb0] ss:$12 sps:$4 sm:$0xff]   ;;  %v1782_v14 = vld [vmem:[#allocation7 + $0x48] ss:$12 sps:$4 sm:$0xff]  }
  0x66   : > { %v288_v12 = vld [vmem:[%s2135_s0 + $0x8] sm:$0xff]  ;;  %1643 = vmatprep.subr.bf16.mxu1 %v1792_v10  ;;  %v1793_v13 = vld [vmem:[#allocation7 + $0x98] ss:$12 sps:$4 sm:$0xff]   ;;  %v1783_v17 = vld [vmem:[#allocation7 + $0x34] ss:$12 sps:$4 sm:$0xff]   ;;  %s720_s27 = sld [smem:[#allocation2]] }
  0x67   : > { %1644 = vmatpush3.bf16.msra.mxu1 %v1792_v10  ;;  %v303_v15 = vpack.c.bf16 %v288_v12, %v287_v11  ;;  %v1794_v16 = vld [vmem:[#allocation7 + $0x80] ss:$12 sps:$4 sm:$0xff]   ;;  %v1785_v18 = vld [vmem:[#allocation7 + $0x30] ss:$12 sps:$4 sm:$0xff]   ;;  %v1795_v19 = vld [vmem:[#allocation7 + $0x68] ss:$12 sps:$4 sm:$0xff]  }
  0x68   : > { %474 = vmatpush1.bf16.msra.mxu0 %v1773_v4  ;;  %1645 = vmatprep.subr.bf16.mxu1 %v1793_v13  ;;  %v1786_v20 = vld [vmem:[#allocation7 + $0x1c] ss:$12 sps:$4 sm:$0xff]   ;;  %v1788_v21 = vld [vmem:[#allocation7 + $0x18] ss:$12 sps:$4 sm:$0xff]   ;;  %v1791_v24 = vld [vmem:[#allocation7] ss:$12 sps:$4 sm:$0xff]  }
  0x69   : > { %475 = vmatprep.subr.bf16.mxu0 %v1774_v5  ;;  %1659 = vmatprep.mubr.bf16.mxu1 %v303_v15  ;;  %v1796_v22 = vld [vmem:[#allocation7 + $0x50] ss:$12 sps:$4 sm:$0xff]   ;;  %v1797_v25 = vld [vmem:[#allocation7 + $0x38] ss:$12 sps:$4 sm:$0xff]   ;;  %v1798_v26 = vld [vmem:[#allocation7 + $0x20] ss:$12 sps:$4 sm:$0xff]  }
  0x6a   : > { %v1789_v23 = vld [vmem:[#allocation7 + $0x4] ss:$12 sps:$4 sm:$0xff]   ;;  %v290_v28 = vld [vmem:[%s2135_s0 + $0x18] sm:$0xff]  ;;  %v1799_v29 = vld [vmem:[#allocation7 + $0x8] ss:$12 sps:$4 sm:$0xff]   ;;  %s1358_s29 = sld [smem:[#allocation2 + $0x80]] }
  0x6b   : > { %1646 = vmatpush3.bf16.msra.mxu1 %v1793_v13  ;;  %v289_v27 = vld [vmem:[%s2135_s0 + $0x10] sm:$0xff]  ;;  %v291_v31 = vld [vmem:[%s2135_s0 + $0x20] sm:$0xff]  ;;  %v292_v32 = vld [vmem:[%s2135_s0 + $0x28] sm:$0xff]  ;;  %s1341_s7 = sld [smem:[#allocation2 + $0x1]]  ;;  %s1675_s28 = smul.u32 192, %s2129_s11 }
  0x6c   : > { %476 = vmatpush1.bf16.msra.mxu0 %v1776_v6  ;;  %1647 = vmatprep.subr.bf16.mxu1 %v1794_v16  ;;  %v304_v30 = vpack.c.bf16 %v290_v28, %v289_v27  ;;  %v305_v33 = vpack.c.bf16 %v292_v32, %v291_v31  ;;  %v293_v34 = vld [vmem:[%s2135_s0 + $0x30] sm:$0xff]  ;;  %v294_v35 = vld [vmem:[%s2135_s0 + $0x38] sm:$0xff]  ;;  %v295_v36 = vld [vmem:[%s2135_s0 + $0x40] sm:$0xff]  ;;  %s1359_s12 = sld [smem:[#allocation2 + $0x81]]  ;;  %v2173_v52 = vstv %s720_s27  ;;  %s2215_s10 = scalar_lea.vmem [#allocation10], %s1313_s14 }
  0x6d   : > { %477 = vmatprep.subr.bf16.mxu0 %v1777_v7  ;;  %v296_v37 = vld [vmem:[%s2135_s0 + $0x48] sm:$0xff]  ;;  %v306_v38 = vpack.c.bf16 %v294_v35, %v293_v34  ;;  %v297_v40 = vld [vmem:[%s2135_s0 + $0x50] sm:$0xff]  ;;  %v298_v41 = vld [vmem:[%s2135_s0 + $0x58] sm:$0xff]  ;;  %s1393_s16 = sld [smem:[#allocation2 + $0x101]]  ;;  %s2202_s9 = scalar_lea.vmem [#allocation9], %s1675_s28 }
  0x6e   : > { %v307_v39 = vpack.c.bf16 %v296_v37, %v295_v36  ;;  %v299_v42 = vld [vmem:[%s2135_s0 + $0x60] sm:$0xff]  ;;  %v300_v43 = vld [vmem:[%s2135_s0 + $0x68] sm:$0xff]  ;;  %v308_v44 = vpack.c.bf16 %v298_v41, %v297_v40  ;;  %v301_v46 = vld [vmem:[%s2135_s0 + $0x70] sm:$0xff]  ;;  %s1392_s26 = sld [smem:[#allocation2 + $0x100]]  ;;  %s1119_s13 = scalar_lea.sflag [#allocation4], %s2129_s11 }
  0x6f   : > { %1648 = vmatpush3.bf16.msra.mxu1 %v1794_v16  ;;  %v309_v45 = vpack.c.bf16 %v300_v43, %v299_v42  ;;  %v302_v47 = vld [vmem:[%s2135_s0 + $0x78] sm:$0xff]  ;;  %s1124_s15 = scalar_lea.sflag [#allocation11], %s2129_s11 }
  0x70   : > { %478 = vmatpush1.bf16.msra.mxu0 %v1779_v8  ;;  %1649 = vmatprep.subr.bf16.mxu1 %v1795_v19  ;;  %v310_v48 = vpack.c.bf16 %v302_v47, %v301_v46  ;;  %v2177_v55 = vstv %s1358_s29 }
  0x71   : > { %479 = vmatprep.subr.bf16.mxu0 %v1780_v9  ;;  %v2169_v50 = vstv %s1341_s7 }
  0x72   : > { %v2171_v51 = vstv %s1359_s12 }
  0x73   : > { %1650 = vmatpush3.bf16.msra.mxu1 %v1795_v19  ;;  %v2175_v54 = vstv %s1393_s16 }
  0x74   : > { %480 = vmatpush1.bf16.msra.mxu0 %v1782_v14  ;;  %1651 = vmatprep.subr.bf16.mxu1 %v1796_v22  ;;  %v2179_v56 = vstv %s1392_s26  ;;  %v2197_v14 = vld [vmem:[%s2417_s3] ss:$0 sm:$0xff] }
  0x75   : > { %481 = vmatprep.subr.bf16.mxu0 %v1783_v17 }
  0x77   : > { %1652 = vmatpush3.bf16.msra.mxu1 %v1796_v22 }
  0x78   : > { %482 = vmatpush1.bf16.msra.mxu0 %v1785_v18  ;;  %1653 = vmatprep.subr.bf16.mxu1 %v1797_v25 }
  0x79   : > { %483 = vmatprep.subr.bf16.mxu0 %v1786_v20 }
  0x7b   : > { %1654 = vmatpush3.bf16.msra.mxu1 %v1797_v25 }
  0x7c   : > { %484 = vmatpush1.bf16.msra.mxu0 %v1788_v21  ;;  %1655 = vmatprep.subr.bf16.mxu1 %v1798_v26 }
  0x7d   : > { %485 = vmatprep.subr.bf16.mxu0 %v1789_v23 }
  0x7f   : > { %1656 = vmatpush3.bf16.msra.mxu1 %v1798_v26 }
  0x80   : > { %486 = vmatpush1.bf16.msra.mxu0 %v1791_v24  ;;  %1657 = vmatprep.subr.bf16.mxu1 %v1799_v29 }
  0x83   : > { %504 = vmatmul.mubr.bf16.vlgmr.msra.gmra.mxu0 %v303_v15  ;;  %1658 = vmatpush3.bf16.msra.mxu1 %v1799_v29 }
  0x84   : > { %513 = vmatprep.mubr.bf16.mxu0 %v1954_v2 }
  0x86   : > { %1660 = vmatmul.mubr.bf16.vlgmr.msra.gmra.mxu1 %v304_v30 }
  0x87   : > { %1663 = vmatprep.mubr.bf16.mxu1 %v305_v33 }
  0x8b   : > { %514 = vmatmul.mubr.bf16.gmra.mxu0 %v304_v30 }
  0x8c   : > { %523 = vmatprep.mubr.bf16.mxu0 %v1954_v2 }
  0x8e   : > { %1664 = vmatmul.mubr.bf16.gmra.mxu1 %v306_v38 }
  0x8f   : > { %1667 = vmatprep.mubr.bf16.mxu1 %v307_v39 }
  0x93   : > { %524 = vmatmul.mubr.bf16.gmra.mxu0 %v305_v33 }
  0x94   : > { %533 = vmatprep.mubr.bf16.mxu0 %v1954_v2 }
  0x96   : > { %1668 = vmatmul.mubr.bf16.gmra.mxu1 %v308_v44 }
  0x97   : > { %1671 = vmatprep.mubr.bf16.mxu1 %v309_v45 }
  0x9b   : > { %534 = vmatmul.mubr.bf16.gmra.mxu0 %v306_v38 }
  0x9c   : > { %543 = vmatprep.mubr.bf16.mxu0 %v1954_v2 }
  0x9e   : > { %1672 = vmatmul.mubr.bf16.gmra.mxu1 %v310_v48 }
  0xa3   : > { %544 = vmatmul.mubr.bf16.gmra.mxu0 %v307_v39 }
  0xa4   : > { %553 = vmatprep.mubr.bf16.mxu0 %v1954_v2 }
  0xab   : > { %554 = vmatmul.mubr.bf16.gmra.mxu0 %v308_v44 }
  0xac   : > { %563 = vmatprep.mubr.bf16.mxu0 %v1954_v2 }
  0xb3   : > { %564 = vmatmul.mubr.bf16.gmra.mxu0 %v309_v45 }
  0xb4   : > { %573 = vmatprep.mubr.bf16.mxu0 %v1954_v2 }
  0xbb   : > { %574 = vmatmul.mubr.bf16.gmra.mxu0 %v310_v48 }
 0x143   : > { %v505_v49 = vpop.f32.mrf.mxu0 }
 0x144   : > { %v722_v60 = vmul.f32 %v2173_v52, %v505_v49  ;;  %v854_v62 = vmul.f32 %v2177_v55, %v505_v49  ;;  %v987_v63 = vmul.f32 %v2179_v56, %v505_v49 }
 0x145   : > { %v507_v53 = vpop.f32.mrf.mxu0 }
 0x146   : > { %v740_v57 = vmul.f32 %v2169_v50, %v507_v53  ;;  %v872_v58 = vmul.f32 %v2171_v51, %v507_v53  ;;  %v1005_v61 = vmul.f32 %v2175_v54, %v507_v53  ;;  %v1661_v19 = vpop.f32.mrf.mxu1 }
 0x147   : > { %v509_v59 = vpop.f32.mrf.mxu0  ;;  %v690_v23 = vadd.f32 %v1661_v19, %v2197_v14 }
 0x148   : > { %v723_v0 = vmul.f32 %v2173_v52, %v509_v59  ;;  %v855_v1 = vmul.f32 %v2177_v55, %v509_v59  ;;  %v988_v3 = vmul.f32 %v2179_v56, %v509_v59  ;;  %v756_v7 = vadd.f32 %v740_v57, %v722_v60  ;;  %v618_v27 = vpop.f32.mrf.mxu1 }
 0x149   : > { %v511_v2 = vpop.f32.mrf.mxu0  ;;  %v888_v8 = vadd.f32 %v872_v58, %v854_v62  ;;  %v1021_v10 = vadd.f32 %v1005_v61, %v987_v63  ;;  %706 = vst [vmem:[%s2215_s10 + $0x10] sm:$0xff] %v690_v23  ;;  %v688_v32 = vadd.f32 %v2197_v14, %v618_v27 }
 0x14a   : > { %v741_v4 = vmul.f32 %v2169_v50, %v511_v2  ;;  %v873_v5 = vmul.f32 %v2171_v51, %v511_v2  ;;  %v1006_v6 = vmul.f32 %v2175_v54, %v511_v2  ;;  %v1662_v37 = vpop.f32.mrf.mxu1 }
 0x14b   : > { %v515_v9 = vpop.f32.mrf.mxu0  ;;  %704 = vst [vmem:[%s2215_s10] sm:$0xff] %v688_v32  ;;  %v691_v41 = vadd.f32 %v1662_v37, %v2197_v14 }
 0x14c   : > { %v757_v11 = vadd.f32 %v741_v4, %v723_v0  ;;  %v889_v12 = vadd.f32 %v873_v5, %v855_v1  ;;  %v1022_v13 = vadd.f32 %v1006_v6, %v988_v3  ;;  %v724_v24 = vmul.f32 %v2173_v52, %v515_v9  ;;  %v621_v46 = vpop.f32.mrf.mxu1 }
 0x14d   : > { %v517_v15 = vpop.f32.mrf.mxu0  ;;  %v856_v25 = vmul.f32 %v2177_v55, %v515_v9  ;;  %v989_v28 = vmul.f32 %v2179_v56, %v515_v9  ;;  %707 = vst [vmem:[%s2215_s10 + $0x18] sm:$0xff] %v691_v41  ;;  %v689_v48 = vadd.f32 %v2197_v14, %v621_v46 }
 0x14e   : > { %v1487_v16 = vpack.c.bf16 %v757_v11, %v756_v7  ;;  %v1527_v17 = vpack.c.bf16 %v889_v12, %v888_v8  ;;  %v1567_v18 = vpack.c.bf16 %v1022_v13, %v1021_v10  ;;  %v742_v20 = vmul.f32 %v2169_v50, %v517_v15  ;;  %v1665_v58 = vpop.f32.mrf.mxu1 }
 0x14f   : > { %v874_v21 = vmul.f32 %v2171_v51, %v517_v15  ;;  %v519_v22 = vpop.f32.mrf.mxu0  ;;  %v1007_v26 = vmul.f32 %v2175_v54, %v517_v15  ;;  %705 = vst [vmem:[%s2215_s10 + $0x8] sm:$0xff] %v689_v48  ;;  %v694_v62 = vadd.f32 %v1665_v58, %v2197_v14 }
 0x150   : > { %1488 = vst [vmem:[%s2202_s9] sm:$0xff] %v1487_v16   ;;  %1611 = vst [vmem:[%s2202_s9 + $0x40] sm:$0xff] %v1527_v17   ;;  %v725_v29 = vmul.f32 %v2173_v52, %v519_v22  ;;  %v857_v30 = vmul.f32 %v2177_v55, %v519_v22  ;;  %v990_v33 = vmul.f32 %v2179_v56, %v519_v22  ;;  %v634_v2 = vpop.f32.mrf.mxu1 }
 0x151   : > { %1619 = vst [vmem:[%s2202_s9 + $0x80] sm:$0xff] %v1567_v18   ;;  %v521_v31 = vpop.f32.mrf.mxu0  ;;  %v758_v38 = vadd.f32 %v742_v20, %v724_v24  ;;  %v890_v39 = vadd.f32 %v874_v21, %v856_v25  ;;  %v1023_v42 = vadd.f32 %v1007_v26, %v989_v28  ;;  %710 = vst [vmem:[%s2215_s10 + $0x30] sm:$0xff] %v694_v62 }
 0x152   : > { %v743_v34 = vmul.f32 %v2169_v50, %v521_v31  ;;  %v875_v35 = vmul.f32 %v2171_v51, %v521_v31  ;;  %v1008_v36 = vmul.f32 %v2175_v54, %v521_v31  ;;  %v692_v7 = vadd.f32 %v2197_v14, %v634_v2  ;;  %v1666_v12 = vpop.f32.mrf.mxu1 }
 0x153   : > { %v525_v40 = vpop.f32.mrf.mxu0  ;;  %v695_v17 = vadd.f32 %v1666_v12, %v2197_v14 }
 0x154   : > { %v759_v43 = vadd.f32 %v743_v34, %v725_v29  ;;  %v891_v44 = vadd.f32 %v875_v35, %v857_v30  ;;  %v1024_v45 = vadd.f32 %v1008_v36, %v990_v33  ;;  %v726_v63 = vmul.f32 %v2173_v52, %v525_v40  ;;  %708 = vst [vmem:[%s2215_s10 + $0x20] sm:$0xff] %v692_v7  ;;  %v637_v22 = vpop.f32.mrf.mxu1 }
 0x155   : > { %v527_v47 = vpop.f32.mrf.mxu0  ;;  %v858_v0 = vmul.f32 %v2177_v55, %v525_v40  ;;  %v991_v3 = vmul.f32 %v2179_v56, %v525_v40  ;;  %711 = vst [vmem:[%s2215_s10 + $0x38] sm:$0xff] %v695_v17  ;;  %v693_v24 = vadd.f32 %v2197_v14, %v637_v22 }
 0x156   : > { %v1492_v49 = vpack.c.bf16 %v759_v43, %v758_v38  ;;  %v1532_v53 = vpack.c.bf16 %v891_v44, %v890_v39  ;;  %v1572_v57 = vpack.c.bf16 %v1024_v45, %v1023_v42  ;;  %v744_v59 = vmul.f32 %v2169_v50, %v527_v47  ;;  %v1669_v28 = vpop.f32.mrf.mxu1 }
 0x157   : > { %v876_v60 = vmul.f32 %v2171_v51, %v527_v47  ;;  %v529_v61 = vpop.f32.mrf.mxu0  ;;  %v1009_v1 = vmul.f32 %v2175_v54, %v527_v47  ;;  %709 = vst [vmem:[%s2215_s10 + $0x28] sm:$0xff] %v693_v24  ;;  %v698_v32 = vadd.f32 %v1669_v28, %v2197_v14 }
 0x158   : > { %1604 = vst [vmem:[%s2202_s9 + $0x8] sm:$0xff] %v1492_v49   ;;  %1612 = vst [vmem:[%s2202_s9 + $0x48] sm:$0xff] %v1532_v53   ;;  %v727_v4 = vmul.f32 %v2173_v52, %v529_v61  ;;  %v859_v5 = vmul.f32 %v2177_v55, %v529_v61  ;;  %v992_v8 = vmul.f32 %v2179_v56, %v529_v61  ;;  %v650_v36 = vpop.f32.mrf.mxu1 }
 0x159   : > { %1620 = vst [vmem:[%s2202_s9 + $0x88] sm:$0xff] %v1572_v57   ;;  %v531_v6 = vpop.f32.mrf.mxu0  ;;  %v760_v13 = vadd.f32 %v744_v59, %v726_v63  ;;  %v892_v15 = vadd.f32 %v876_v60, %v858_v0  ;;  %v1025_v18 = vadd.f32 %v1009_v1, %v991_v3  ;;  %714 = vst [vmem:[%s2215_s10 + $0x50] sm:$0xff] %v698_v32 }
 0x15a   : > { %v745_v9 = vmul.f32 %v2169_v50, %v531_v6  ;;  %v877_v10 = vmul.f32 %v2171_v51, %v531_v6  ;;  %v1010_v11 = vmul.f32 %v2175_v54, %v531_v6  ;;  %v696_v41 = vadd.f32 %v2197_v14, %v650_v36  ;;  %v1670_v46 = vpop.f32.mrf.mxu1 }
 0x15b   : > { %v535_v16 = vpop.f32.mrf.mxu0  ;;  %v699_v53 = vadd.f32 %v1670_v46, %v2197_v14 }
 0x15c   : > { %v761_v19 = vadd.f32 %v745_v9, %v727_v4  ;;  %v893_v20 = vadd.f32 %v877_v10, %v859_v5  ;;  %v1026_v21 = vadd.f32 %v1010_v11, %v992_v8  ;;  %v728_v33 = vmul.f32 %v2173_v52, %v535_v16  ;;  %712 = vst [vmem:[%s2215_s10 + $0x40] sm:$0xff] %v696_v41  ;;  %v653_v61 = vpop.f32.mrf.mxu1 }
 0x15d   : > { %v537_v23 = vpop.f32.mrf.mxu0  ;;  %v860_v34 = vmul.f32 %v2177_v55, %v535_v16  ;;  %v993_v37 = vmul.f32 %v2179_v56, %v535_v16  ;;  %715 = vst [vmem:[%s2215_s10 + $0x58] sm:$0xff] %v699_v53  ;;  %v697_v63 = vadd.f32 %v2197_v14, %v653_v61 }
 0x15e   : > { %v1497_v25 = vpack.c.bf16 %v761_v19, %v760_v13  ;;  %v1537_v26 = vpack.c.bf16 %v893_v20, %v892_v15  ;;  %v1577_v27 = vpack.c.bf16 %v1026_v21, %v1025_v18  ;;  %v746_v29 = vmul.f32 %v2169_v50, %v537_v23  ;;  %v1673_v3 = vpop.f32.mrf.mxu1 }
 0x15f   : > { %v878_v30 = vmul.f32 %v2171_v51, %v537_v23  ;;  %v539_v31 = vpop.f32.mrf.mxu0  ;;  %v1011_v35 = vmul.f32 %v2175_v54, %v537_v23  ;;  %713 = vst [vmem:[%s2215_s10 + $0x48] sm:$0xff] %v697_v63  ;;  %v702_v7 = vadd.f32 %v1673_v3, %v2197_v14 }
 0x160   : > { %1605 = vst [vmem:[%s2202_s9 + $0x10] sm:$0xff] %v1497_v25   ;;  %1613 = vst [vmem:[%s2202_s9 + $0x50] sm:$0xff] %v1537_v26   ;;  %v729_v38 = vmul.f32 %v2173_v52, %v539_v31  ;;  %v861_v39 = vmul.f32 %v2177_v55, %v539_v31  ;;  %v994_v42 = vmul.f32 %v2179_v56, %v539_v31  ;;  %v666_v11 = vpop.f32.mrf.mxu1 }
 0x161   : > { %1621 = vst [vmem:[%s2202_s9 + $0x90] sm:$0xff] %v1577_v27   ;;  %v541_v40 = vpop.f32.mrf.mxu0  ;;  %v762_v47 = vadd.f32 %v746_v29, %v728_v33  ;;  %v894_v48 = vadd.f32 %v878_v30, %v860_v34  ;;  %v1027_v57 = vadd.f32 %v1011_v35, %v993_v37  ;;  %718 = vst [vmem:[%s2215_s10 + $0x70] sm:$0xff] %v702_v7 }
 0x162   : > { %v747_v43 = vmul.f32 %v2169_v50, %v541_v40  ;;  %v879_v44 = vmul.f32 %v2171_v51, %v541_v40  ;;  %v1012_v45 = vmul.f32 %v2175_v54, %v541_v40  ;;  %v700_v17 = vadd.f32 %v2197_v14, %v666_v11  ;;  %v1674_v22 = vpop.f32.mrf.mxu1 }
 0x163   : > { %v545_v49 = vpop.f32.mrf.mxu0  ;;  %v703_v26 = vadd.f32 %v1674_v22, %v2197_v14 }
 0x164   : > { %v763_v58 = vadd.f32 %v747_v43, %v729_v38  ;;  %v895_v59 = vadd.f32 %v879_v44, %v861_v39  ;;  %v1028_v60 = vadd.f32 %v1012_v45, %v994_v42  ;;  %v730_v8 = vmul.f32 %v2173_v52, %v545_v49  ;;  %716 = vst [vmem:[%s2215_s10 + $0x60] sm:$0xff] %v700_v17  ;;  %v669_v31 = vpop.f32.mrf.mxu1 }
 0x165   : > { %v547_v62 = vpop.f32.mrf.mxu0  ;;  %v862_v9 = vmul.f32 %v2177_v55, %v545_v49  ;;  %v995_v12 = vmul.f32 %v2179_v56, %v545_v49  ;;  %719 = vst [vmem:[%s2215_s10 + $0x78] sm:$0xff] %v703_v26  ;;  %v701_v33 = vadd.f32 %v2197_v14, %v669_v31 }
 0x166   : > { %v1502_v0 = vpack.c.bf16 %v763_v58, %v762_v47  ;;  %v1542_v1 = vpack.c.bf16 %v895_v59, %v894_v48  ;;  %v1582_v2 = vpack.c.bf16 %v1028_v60, %v1027_v57  ;;  %v748_v4 = vmul.f32 %v2169_v50, %v547_v62 }
 0x167   : > { %v880_v5 = vmul.f32 %v2171_v51, %v547_v62  ;;  %v549_v6 = vpop.f32.mrf.mxu0  ;;  %v1013_v10 = vmul.f32 %v2175_v54, %v547_v62  ;;  %717 = vst [vmem:[%s2215_s10 + $0x68] sm:$0xff] %v701_v33 }
 0x168   : > { %1606 = vst [vmem:[%s2202_s9 + $0x18] sm:$0xff] %v1502_v0   ;;  %1614 = vst [vmem:[%s2202_s9 + $0x58] sm:$0xff] %v1542_v1   ;;  %v731_v13 = vmul.f32 %v2173_v52, %v549_v6  ;;  %v863_v15 = vmul.f32 %v2177_v55, %v549_v6  ;;  %v996_v18 = vmul.f32 %v2179_v56, %v549_v6 }
 0x169   : > { %1622 = vst [vmem:[%s2202_s9 + $0x98] sm:$0xff] %v1582_v2   ;;  %v551_v16 = vpop.f32.mrf.mxu0  ;;  %v764_v23 = vadd.f32 %v748_v4, %v730_v8  ;;  %v896_v24 = vadd.f32 %v880_v5, %v862_v9  ;;  %v1029_v27 = vadd.f32 %v1013_v10, %v995_v12 }
 0x16a   : > { %v749_v19 = vmul.f32 %v2169_v50, %v551_v16  ;;  %v881_v20 = vmul.f32 %v2171_v51, %v551_v16  ;;  %v1014_v21 = vmul.f32 %v2175_v54, %v551_v16 }
 0x16b   : > { %v555_v25 = vpop.f32.mrf.mxu0 }
 0x16c   : > { %v765_v28 = vadd.f32 %v749_v19, %v731_v13  ;;  %v897_v29 = vadd.f32 %v881_v20, %v863_v15  ;;  %v1030_v30 = vadd.f32 %v1014_v21, %v996_v18  ;;  %v732_v40 = vmul.f32 %v2173_v52, %v555_v25 }
 0x16d   : > { %v557_v32 = vpop.f32.mrf.mxu0  ;;  %v864_v42 = vmul.f32 %v2177_v55, %v555_v25  ;;  %v997_v14 = vmul.f32 %v2179_v56, %v555_v25 }
 0x16e   : > { %v1507_v34 = vpack.c.bf16 %v765_v28, %v764_v23  ;;  %v1547_v35 = vpack.c.bf16 %v897_v29, %v896_v24  ;;  %v1587_v36 = vpack.c.bf16 %v1030_v30, %v1029_v27  ;;  %v750_v37 = vmul.f32 %v2169_v50, %v557_v32 }
 0x16f   : > { %v882_v38 = vmul.f32 %v2171_v51, %v557_v32  ;;  %v559_v39 = vpop.f32.mrf.mxu0  ;;  %v1015_v41 = vmul.f32 %v2175_v54, %v557_v32 }
 0x170   : > { %1607 = vst [vmem:[%s2202_s9 + $0x20] sm:$0xff] %v1507_v34   ;;  %1615 = vst [vmem:[%s2202_s9 + $0x60] sm:$0xff] %v1547_v35   ;;  %v733_v43 = vmul.f32 %v2173_v52, %v559_v39  ;;  %v865_v44 = vmul.f32 %v2177_v55, %v559_v39  ;;  %v998_v46 = vmul.f32 %v2179_v56, %v559_v39 }
 0x171   : > { %1623 = vst [vmem:[%s2202_s9 + $0xa0] sm:$0xff] %v1587_v36   ;;  %v561_v45 = vpop.f32.mrf.mxu0  ;;  %v766_v53 = vadd.f32 %v750_v37, %v732_v40  ;;  %v898_v57 = vadd.f32 %v882_v38, %v864_v42  ;;  %v1031_v59 = vadd.f32 %v1015_v41, %v997_v14 }
 0x172   : > { %v751_v47 = vmul.f32 %v2169_v50, %v561_v45  ;;  %v883_v48 = vmul.f32 %v2171_v51, %v561_v45  ;;  %v1016_v49 = vmul.f32 %v2175_v54, %v561_v45 }
 0x173   : > { %v565_v58 = vpop.f32.mrf.mxu0 }
 0x174   : > { %v767_v60 = vadd.f32 %v751_v47, %v733_v43  ;;  %v899_v61 = vadd.f32 %v883_v48, %v865_v44  ;;  %v1032_v62 = vadd.f32 %v1016_v49, %v998_v46  ;;  %v734_v6 = vmul.f32 %v2173_v52, %v565_v58 }
 0x175   : > { %v567_v63 = vpop.f32.mrf.mxu0  ;;  %v866_v8 = vmul.f32 %v2177_v55, %v565_v58  ;;  %v999_v9 = vmul.f32 %v2179_v56, %v565_v58 }
 0x176   : > { %v1512_v0 = vpack.c.bf16 %v767_v60, %v766_v53  ;;  %v1552_v1 = vpack.c.bf16 %v899_v61, %v898_v57  ;;  %v1592_v2 = vpack.c.bf16 %v1032_v62, %v1031_v59  ;;  %v752_v3 = vmul.f32 %v2169_v50, %v567_v63 }
 0x177   : > { %v884_v4 = vmul.f32 %v2171_v51, %v567_v63  ;;  %v569_v5 = vpop.f32.mrf.mxu0  ;;  %v1017_v7 = vmul.f32 %v2175_v54, %v567_v63 }
 0x178   : > { %1608 = vst [vmem:[%s2202_s9 + $0x28] sm:$0xff] %v1512_v0   ;;  %1616 = vst [vmem:[%s2202_s9 + $0x68] sm:$0xff] %v1552_v1   ;;  %v735_v10 = vmul.f32 %v2173_v52, %v569_v5  ;;  %v867_v11 = vmul.f32 %v2177_v55, %v569_v5  ;;  %v1000_v13 = vmul.f32 %v2179_v56, %v569_v5 }
 0x179   : > { %1624 = vst [vmem:[%s2202_s9 + $0xa8] sm:$0xff] %v1592_v2   ;;  %v571_v12 = vpop.f32.mrf.mxu0  ;;  %v768_v18 = vadd.f32 %v752_v3, %v734_v6  ;;  %v900_v19 = vadd.f32 %v884_v4, %v866_v8  ;;  %v1033_v21 = vadd.f32 %v1017_v7, %v999_v9 }
 0x17a   : > { %v753_v15 = vmul.f32 %v2169_v50, %v571_v12  ;;  %v885_v16 = vmul.f32 %v2171_v51, %v571_v12  ;;  %v1018_v17 = vmul.f32 %v2175_v54, %v571_v12 }
 0x17b   : > { %v575_v20 = vpop.f32.mrf.mxu0 }
 0x17c   : > { %v769_v22 = vadd.f32 %v753_v15, %v735_v10  ;;  %v901_v23 = vadd.f32 %v885_v16, %v867_v11  ;;  %v1034_v24 = vadd.f32 %v1018_v17, %v1000_v13  ;;  %v736_v32 = vmul.f32 %v2173_v52, %v575_v20 }
 0x17d   : > { %v577_v25 = vpop.f32.mrf.mxu0  ;;  %v868_v34 = vmul.f32 %v2177_v55, %v575_v20  ;;  %v1001_v35 = vmul.f32 %v2179_v56, %v575_v20 }
 0x17e   : > { %v1517_v26 = vpack.c.bf16 %v769_v22, %v768_v18  ;;  %v1557_v27 = vpack.c.bf16 %v901_v23, %v900_v19  ;;  %v1597_v28 = vpack.c.bf16 %v1034_v24, %v1033_v21  ;;  %v754_v29 = vmul.f32 %v2169_v50, %v577_v25 }
 0x17f   : > { %v886_v30 = vmul.f32 %v2171_v51, %v577_v25  ;;  %v579_v31 = vpop.f32.mrf.mxu0  ;;  %v1019_v33 = vmul.f32 %v2175_v54, %v577_v25 }
 0x180   : > { %1609 = vst [vmem:[%s2202_s9 + $0x30] sm:$0xff] %v1517_v26   ;;  %1617 = vst [vmem:[%s2202_s9 + $0x70] sm:$0xff] %v1557_v27   ;;  %v737_v36 = vmul.f32 %v2173_v52, %v579_v31  ;;  %v869_v37 = vmul.f32 %v2177_v55, %v579_v31  ;;  %v1002_v39 = vmul.f32 %v2179_v56, %v579_v31 }
 0x181   : > { %1625 = vst [vmem:[%s2202_s9 + $0xb0] sm:$0xff] %v1597_v28   ;;  %v581_v38 = vpop.f32.mrf.mxu0  ;;  %v770_v14 = vadd.f32 %v754_v29, %v736_v32  ;;  %v902_v43 = vadd.f32 %v886_v30, %v868_v34  ;;  %v1035_v44 = vadd.f32 %v1019_v33, %v1001_v35 }
 0x182   : > { %v755_v40 = vmul.f32 %v2169_v50, %v581_v38  ;;  %v887_v41 = vmul.f32 %v2171_v51, %v581_v38  ;;  %v1020_v42 = vmul.f32 %v2175_v54, %v581_v38 }
 0x184   : > { %v771_v52 = vadd.f32 %v755_v40, %v737_v36  ;;  %v903_v45 = vadd.f32 %v887_v41, %v869_v37  ;;  %v1036_v46 = vadd.f32 %v1020_v42, %v1002_v39 }
 0x186   : > { %v1522_v55 = vpack.c.bf16 %v771_v52, %v770_v14  ;;  %v1562_v47 = vpack.c.bf16 %v903_v45, %v902_v43  ;;  %v1602_v48 = vpack.c.bf16 %v1036_v46, %v1035_v44 }
 0x188   : > { %1610 = vst [vmem:[%s2202_s9 + $0x38] sm:$0xff] %v1522_v55   ;;  %1618 = vst [vmem:[%s2202_s9 + $0x78] sm:$0xff] %v1562_v47  }
 0x189   : > { %1626 = vst [vmem:[%s2202_s9 + $0xb8] sm:$0xff] %v1602_v48  }
 0x18a   : > { %s1482_s23 = sshll.u32 %s2016_s22, 10  ;;  %s1147_s14 = sshll.u32 %s2202_s9, 4  ;;  %s1148_s14 = int_to_ptr.vmem [resolvable:$true] %s1147_s14 }
 0x18b   : > { %s1136_s27 = scalar_lea.hbm %s2418_s4, %s1482_s23  ;;  %s1955_s29 = smov 1024  }
 0x18c   : > { %p2442_p10 = scmp.ne.s32.totalorder %s2429_s30, 0  ;;  %s1956_s7 = smov 3072  }
 0x18d   : > { %s1957_s12 = smov 16   ;;  %s1958_s16 = smov 64  }
 0x18e   : > { %1686 = sst [smem:[#allocation13]] (%p2442_p10), %s1955_s29  ;;  %s1959_s26 = smov 4  }
 0x18f   : > { %1687 = sst [smem:[#allocation13 + $0x1]] (%p2442_p10), %s1956_s7  ;;  %s1960_s28 = smov 131072  }
 0x190   : > { %1688 = sst [smem:[#allocation13 + $0x2]] (%p2442_p10), %s1957_s12  ;;  %s1961_s8 = smov 0  }
 0x191   : > { %1689 = sst [smem:[#allocation13 + $0x3]] (%p2442_p10), %s1958_s16  ;;  %s1483_s17 = sshll.u32 %s2016_s22, 11 }
 0x192   : > { %1690 = sst [smem:[#allocation13 + $0x4]] (%p2442_p10), %s1958_s16  ;;  %s1176_s9 = sshll.u32 %s2215_s10, 4  ;;  %s2373_s9 = int_to_ptr.vmem [resolvable:$true] %s1176_s9 }
 0x193   : > { %1691 = sst [smem:[#allocation13 + $0x5]] (%p2442_p10), %s1959_s26  ;;  %s2371_s0 = scalar_lea.hbm %s2419_s5, %s1483_s17 }
 0x194   : > { %1692 = dma.general (%p2442_p10), %s1148_s14, 3072, %s1136_s27, %s1119_s13, %s1960_s28, [#allocation13], %s1961_s8, 0  }
 0x195   : > { %s1869_s29 = scalar_lea.vmem %s2373_s9, 2048  ;;  %s1962_s13 = smov [#allocation10]  }
 0x196   : > { %p1870_p1 = scmp.ne.s32.totalorder %s2373_s9, %s1869_s29  ;;  %s1873_s14 = sshll.u32 %s1962_s13, 4  ;;  %s1874_s14 = int_to_ptr.vmem [resolvable:$false] %s1873_s14 }
 0x197   : > { %s1875_s22 = scalar_lea.vmem %s1874_s14, 4096  ;;  %p1876_p7 = scmp.lt.s32.totalorder %s2373_s9, %s1874_s14 }
 0x198   : > { %p1871_p5 = pnand %p1870_p1, %p2442_p10  ;;  %p1877_p9 = scmp.lt.s32.totalorder %s1875_s22, %s1869_s29 }
 0x19a   : > { %p1872_p0 = pneg %p1871_p5  ;;  %p1878_p4 = por %p1877_p9, %p1876_p7 }
 0x19c   : > { %p1879_p12 = pnand %p1878_p4, %p1872_p0 }
 0x19e   : > { %1882 = shalt.err (!%p1879_p12)
}
 0x19f   : > { %s1883_s10 = scalar_lea.hbm %s2371_s0, 2048  ;;  %s1887_s12 = scalar_lea.hbm %s2419_s5, 6144 }
 0x1a0   : > { %p1884_p11 = scmp.ne.s32.totalorder %s2371_s0, %s1883_s10  ;;  %p1888_p6 = scmp.lt.s32.totalorder %s2371_s0, %s2419_s5 }
 0x1a1   : > { %p1889_p3 = scmp.lt.s32.totalorder %s1887_s12, %s1883_s10 }
 0x1a2   : > { %p1885_p13 = pnand %p1884_p11, %p2442_p10 }
 0x1a3   : > { %p1890_p8 = por %p1889_p3, %p1888_p6 }
 0x1a4   : > { %p1886_p2 = pneg %p1885_p13 }
 0x1a6   : > { %p1891_p1 = pnand %p1890_p8, %p1886_p2 }
 0x1a8   : > { %1894 = shalt.err (!%p1891_p1)
}
 0x1a9   : > { %s1963_s28 = smov 128   ;;  %s1964_s8 = smov 8  }
 0x1aa   : > { %1693 = dma.vmem_to_hbm [thread:$0]  (%p2442_p10), %s2373_s9, 2048, %s2371_s0, %s1124_s15, %s1963_s28, %s1963_s28, %s1964_s8  }
 0x1ab PF: > { %p1719_p5 = scmp.ge.s32.totalorder %s1945_s21, 2  ;;  %s1191_s17 = sand.u32 1, %s1933_s18  }
 0x1ac   : > { %p2443_p0 = scmp.ne.s32.totalorder %s2430_s6, 0  ;;  %s1192_s23 = scalar_lea.sflag [#allocation4], %s1191_s17 }
 0x1ae   : > { %p1708_p7 = pnand %p1719_p5, %p2443_p0 }
 0x1b0   : > { %p1709_p9 = pneg %p1708_p7 }
 0x1b2   : > { %1924 = dma.done.wait (%p1709_p9), %s1192_s23, 3072  }
 0x1b3   : > { %1926 = vsyncadd (%p1709_p9), %s1192_s23, 4294964224  ;;  %s1201_s25 = scalar_lea.sflag [#allocation11], %s1191_s17 }
 0x1b4   : > { %1928 = dma.done.wait (%p1709_p9), %s1201_s25, 2048  }
 0x1b5   : > { %1930 = vsyncadd (%p1709_p9), %s1201_s25, 4294965248  ;;  %s2444_s30 = sld [smem:[#allocation19_spill]]  ;;  %p24_p10 = scmp.ge.s32.totalorder %s2020_s24, 5  }
 0x1b6   : > { %s2445_s18 = smov %s1937_s19  ;;  %s2446_s19 = smov %s1941_s20 }
 0x1b7   : > { %s2448_s21 = smov %s2020_s24  ;;  %26 = sbr.rel (!%p24_p10) target bundleno = 11 (0xb), region = 114 }
 0x1bb   : > { %s2447_s20 = smov %s2444_s30 }
 0x1bc   :  { %1206 = vsyncpa [#allocation3], 1 }
 0x1bd   :  { %1208 = vsyncpa [#allocation3 + $0x1], 1 }
 0x1be   :  { %1209 = vsyncpa [#allocation8], 1 }
 0x1bf   :  { %1210 = vsyncpa [#allocation4], 1 }
 0x1c0   :  { %1212 = vsyncpa [#allocation4 + $0x1], 1 }
 0x1c1   :  { %1213 = vsyncpa [#allocation11], 1 }
 0x1c2   :  { %1215 = vsyncpa [#allocation11 + $0x1], 1 }
 0x1c3   :  { %1216 = vsyncpa [#allocation5], 1 }
 0x1c4   :  { %1218 = vsyncpa [#allocation5 + $0x1], 1 }

</bundles_post_ra>
